<compile_context>
chip_gen: v7x
topology: tpu7x:2x2x1
jax: 0.10.0
libtpu: 0.0.40
codegen_flags: <defaults>
</compile_context>

<pallas_src>
import functools

import jax
import jax.numpy as jnp
from jax import lax
from jax.experimental import pallas as pl
from jax.experimental.pallas import tpu as pltpu


# -----------------------------------------------------------------------------
# Pallas kernel: 2 fused matmuls + GRU gating for one batch element.
# All tensors are "channels on sublanes, H*W on lanes".
# -----------------------------------------------------------------------------
def _delta_conv_gru_kernel(Ch, has_memory, *refs):
    if has_memory:
        (a_ref, b_ref, s_ref, mu_ref, mr_ref, mcx_ref, mch_ref,
         wa_ref, wb_ref, bias_ref,
         ns_ref, u_ref, r_ref, cx_ref, ch_ref) = refs
    else:
        (a_ref, b_ref, s_ref, wa_ref, wb_ref, bias_ref,
         ns_ref, u_ref, r_ref, cx_ref, ch_ref) = refs

    # Fused conv-as-matmul: (3Ch, KK*C) x (KK*C, HW) -> (3Ch, HW), f32 acc.
    out_a = jnp.dot(wa_ref[...], a_ref[0], preferred_element_type=jnp.float32)
    out_b = jnp.dot(wb_ref[...], b_ref[0], preferred_element_type=jnp.float32)

    bias = bias_ref[...]  # (4*Ch, 1) f32, broadcasts over lanes

    u = out_a[0:Ch] + out_b[0:Ch] + bias[0:Ch]
    r = out_a[Ch:2 * Ch] + out_b[Ch:2 * Ch] + bias[Ch:2 * Ch]
    c_x = out_a[2 * Ch:3 * Ch] + bias[2 * Ch:3 * Ch]
    c_h = out_b[2 * Ch:3 * Ch] + bias[3 * Ch:4 * Ch]

    if has_memory:
        u = u + mu_ref[0]
        r = r + mr_ref[0]
        c_x = c_x + mcx_ref[0]
        c_h = c_h + mch_ref[0]

    sig_u = jax.nn.sigmoid(u)
    sig_r = jax.nn.sigmoid(r)
    out_inputs = jnp.tanh(c_x + sig_r * c_h)
    new_state = s_ref[0] * (1.0 - sig_u) + out_inputs * sig_u

    ns_ref[0] = new_state
    u_ref[0] = u
    r_ref[0] = r
    cx_ref[0] = c_x
    ch_ref[0] = c_h


def _fused_gru_call(a_cols, b_cols, state_flat, mems, wa_T, wb_T, bias):
    """a_cols:(B,KK*Cin,HW) b_cols:(B,KK*Ch,HW) state/mems:(B,Ch,HW) f32."""
    B, KKCin, HW = a_cols.shape
    KKCh = b_cols.shape[1]
    Ch = state_flat.shape[1]
    has_memory = mems is not None

    def batch_spec(rows):
        return pl.BlockSpec((1, rows, HW), lambda i: (i, 0, 0))

    def full_spec(shape):
        nd = len(shape)
        return pl.BlockSpec(shape, lambda i: (0,) * nd)

    in_specs = [batch_spec(KKCin), batch_spec(KKCh), batch_spec(Ch)]
    inputs = [a_cols, b_cols, state_flat]
    if has_memory:
        in_specs += [batch_spec(Ch)] * 4
        inputs += list(mems)
    in_specs += [full_spec(wa_T.shape), full_spec(wb_T.shape),
                 full_spec(bias.shape)]
    inputs += [wa_T, wb_T, bias]

    out_shapes = tuple(
        jax.ShapeDtypeStruct((B, Ch, HW), jnp.float32) for _ in range(5))
    out_specs = [batch_spec(Ch)] * 5

    kernel = functools.partial(_delta_conv_gru_kernel, Ch, has_memory)

    return pl.pallas_call(
        kernel,
        out_shape=out_shapes,
        grid=(B,),
        in_specs=in_specs,
        out_specs=out_specs,
        compiler_params=pltpu.CompilerParams(
            dimension_semantics=("parallel",),
            vmem_limit_bytes=64 * 1024 * 1024),
    )(*inputs)


# -----------------------------------------------------------------------------
# Wrapper-side layout plumbing (im2col, fused weights) — pure XLA.
# -----------------------------------------------------------------------------
def _im2col_chw(x_nchw, K):
    """(B,C,H,W) -> (B, K*K*C, H*W); flat index = (dy*K+dx)*C + c."""
    B, C, H, W = x_nchw.shape
    p = K // 2
    xp = jnp.pad(x_nchw, ((0, 0), (0, 0), (p, p), (p, p)))
    cols = [xp[:, :, dy:dy + H, dx:dx + W].reshape(B, C, H * W)
            for dy in range(K) for dx in range(K)]
    return jnp.concatenate(cols, axis=1)


def _fused_weights(params, Cin, dtype):
    """Build the two transposed, gate-fused weight matrices."""
    def flat(w):  # torch layout (Ch, Ci, K, K) -> (Ch, K*K*Ci), tap-major
        Ch_, Ci, K, _ = w.shape
        return jnp.transpose(w, (0, 2, 3, 1)).reshape(Ch_, K * K * Ci)

    w_u = params["update_w"]
    w_r = params["reset_w"]
    wa_T = jnp.concatenate([flat(w_u[:, :Cin]), flat(w_r[:, :Cin]),
                            flat(params["out_x_w"])], axis=0)
    wb_T = jnp.concatenate([flat(w_u[:, Cin:]), flat(w_r[:, Cin:]),
                            flat(params["out_h_w"])], axis=0)
    return wa_T.astype(dtype), wb_T.astype(dtype)


# -----------------------------------------------------------------------------
# Parameter init (deterministic, mimics torch orthogonal_/constant_ init)
# -----------------------------------------------------------------------------
def _orthogonal(key, cout, cin, k):
    flat = jax.random.normal(key, (cin * k * k, cout), jnp.float32)
    q, _ = jnp.linalg.qr(flat)
    return q.T.reshape(cout, cin, k, k).astype(jnp.float32)


def init_delta_conv_gru_params(key, input_size, hidden_size, kernel_size):
    k0, k1, k2, k3 = jax.random.split(key, 4)
    return {
        "reset_w": _orthogonal(k0, hidden_size, input_size + hidden_size, kernel_size),
        "update_w": _orthogonal(k1, hidden_size, input_size + hidden_size, kernel_size),
        "out_x_w": _orthogonal(k2, hidden_size, input_size, kernel_size),
        "out_h_w": _orthogonal(k3, hidden_size, hidden_size, kernel_size),
        "reset_b": jnp.full((hidden_size,), -1.0, jnp.float32),
        "update_b": jnp.zeros((hidden_size,), jnp.float32),
        "out_x_b": jnp.zeros((hidden_size,), jnp.float32),
        "out_h_b": jnp.zeros((hidden_size,), jnp.float32),
    }


# -----------------------------------------------------------------------------
# Public forward (matches the PyTorch module semantics; NCHW at the boundary)
# -----------------------------------------------------------------------------
def delta_conv_gru_forward(params, x, prev_state=None, prev_memory=None, *,
                           input_size, hidden_size, kernel_size,
                           threshold=0.0, training=True,
                           compute_dtype=jnp.bfloat16):
    B, Cin, H, W = x.shape
    assert Cin == input_size
    Ch = hidden_size
    K = kernel_size
    HW = H * W

    x = x.astype(jnp.float32)
    if prev_state is None:
        prev_state = jnp.zeros((B, Ch, H, W), jnp.float32)
    prev_state = prev_state.astype(jnp.float32)

    if prev_memory is not None:
        delta_h = prev_state - prev_memory["prev_prev_state"]
        delta_x = x - prev_memory["prev_input"]
        if (not training) and threshold > 0:
            delta_x = jnp.where(jnp.abs(delta_x) < threshold, 0.0, delta_x)
            # Faithful to the PyTorch source: the second masked_fill_ mutates
            # delta_x in place and its result is bound to delta_h.
            delta_x = jnp.where(jnp.abs(delta_h) < threshold, 0.0, delta_x)
            delta_h = delta_x
        a, b = delta_x, delta_h
        mems = tuple(prev_memory[k].reshape(B, Ch, HW).astype(jnp.float32)
                     for k in ("u", "r", "c_x", "c_h"))
    else:
        a, b = x, prev_state
        mems = None  # first step: skip DMAing four all-zero memory planes

    a_cols = _im2col_chw(a, K).astype(compute_dtype)
    b_cols = _im2col_chw(b, K).astype(compute_dtype)
    wa_T, wb_T = _fused_weights(params, Cin, compute_dtype)
    bias = jnp.concatenate(
        [params["update_b"], params["reset_b"],
         params["out_x_b"], params["out_h_b"]], axis=0
    ).reshape(4 * Ch, 1).astype(jnp.float32)

    state_flat = prev_state.reshape(B, Ch, HW)

    ns, u, r, c_x, c_h = _fused_gru_call(
        a_cols, b_cols, state_flat, mems, wa_T, wb_T, bias)

    shape4 = (B, Ch, H, W)
    memory = {
        "u": u.reshape(shape4),
        "r": r.reshape(shape4),
        "c_x": c_x.reshape(shape4),
        "c_h": c_h.reshape(shape4),
        "prev_input": x,
        "prev_prev_state": prev_state,
    }
    return ns.reshape(shape4), memory


# -----------------------------------------------------------------------------
# Pure-JAX reference (lax.conv) for numerical validation
# -----------------------------------------------------------------------------
def _conv_ref(x_nchw, w_oikk, bias, pad, compute_dtype):
    y = lax.conv_general_dilated(
        x_nchw.astype(compute_dtype), w_oikk.astype(compute_dtype),
        window_strides=(1, 1), padding=((pad, pad), (pad, pad)),
        dimension_numbers=("NCHW", "OIHW", "NCHW"),
        preferred_element_type=jnp.float32)
    return y + bias.reshape(1, -1, 1, 1)


def _reference_forward(params, x, prev_state, prev_memory, K, compute_dtype):
    pad = K // 2
    if prev_memory is not None:
        delta_h = prev_state - prev_memory["prev_prev_state"]
        delta_x = x - prev_memory["prev_input"]
        stacked = jnp.concatenate([delta_x, delta_h], axis=1)
        u = _conv_ref(stacked, params["update_w"], params["update_b"], pad, compute_dtype) + prev_memory["u"]
        r = _conv_ref(stacked, params["reset_w"], params["reset_b"], pad, compute_dtype) + prev_memory["r"]
        c_x = _conv_ref(delta_x, params["out_x_w"], params["out_x_b"], pad, compute_dtype) + prev_memory["c_x"]
        c_h = _conv_ref(delta_h, params["out_h_w"], params["out_h_b"], pad, compute_dtype) + prev_memory["c_h"]
    else:
        stacked = jnp.concatenate([x, prev_state], axis=1)
        u = _conv_ref(stacked, params["update_w"], params["update_b"], pad, compute_dtype)
        r = _conv_ref(stacked, params["reset_w"], params["reset_b"], pad, compute_dtype)
        c_x = _conv_ref(x, params["out_x_w"], params["out_x_b"], pad, compute_dtype)
        c_h = _conv_ref(prev_state, params["out_h_w"], params["out_h_b"], pad, compute_dtype)
    out_inputs = jnp.tanh(c_x + jax.nn.sigmoid(r) * c_h)
    new_state = prev_state * (1 - jax.nn.sigmoid(u)) + out_inputs * jax.nn.sigmoid(u)
    memory = {"u": u, "r": r, "c_x": c_x, "c_h": c_h,
              "prev_input": x, "prev_prev_state": prev_state}
    return new_state, memory


# -----------------------------------------------------------------------------
if __name__ == "__main__":
    B, Cin, Chid, H, W, K = 2, 4, 8, 16, 16, 3

    key = jax.random.PRNGKey(0)
    kp, kx1, kx2 = jax.random.split(key, 3)
    params = init_delta_conv_gru_params(kp, Cin, Chid, K)
    x1 = jax.random.normal(kx1, (B, Cin, H, W), jnp.float32)
    x2 = jax.random.normal(kx2, (B, Cin, H, W), jnp.float32)
    zeros_state = jnp.zeros((B, Chid, H, W), jnp.float32)

    # ---- strict f32 MXU path vs lax.conv reference ----
    fwd32 = functools.partial(delta_conv_gru_forward, params,
                              input_size=Cin, hidden_size=Chid, kernel_size=K,
                              compute_dtype=jnp.float32)
    s1, m1 = fwd32(x1)                                   # first step (no memory)
    s2, _ = fwd32(x2, prev_state=s1, prev_memory=m1)     # delta step
    s2 = jax.block_until_ready(s2)

    r1, rm1 = _reference_forward(params, x1, zeros_state, None, K, jnp.float32)
    r2, _ = _reference_forward(params, x2, r1, rm1, K, jnp.float32)
    assert jnp.allclose(s1, r1, atol=1e-4, rtol=1e-4)
    assert jnp.allclose(m1["u"], rm1["u"], atol=1e-4, rtol=1e-4)
    assert jnp.allclose(m1["r"], rm1["r"], atol=1e-4, rtol=1e-4)
    assert jnp.allclose(m1["c_x"], rm1["c_x"], atol=1e-4, rtol=1e-4)
    assert jnp.allclose(m1["c_h"], rm1["c_h"], atol=1e-4, rtol=1e-4)
    assert jnp.allclose(s2, r2, atol=1e-4, rtol=1e-4)

    # ---- default bf16 MXU path (f32 accumulation / gating) vs bf16-input conv ----
    fwd16 = functools.partial(delta_conv_gru_forward, params,
                              input_size=Cin, hidden_size=Chid, kernel_size=K,
                              compute_dtype=jnp.bfloat16)
    t1, n1 = fwd16(x1)
    t2, _ = fwd16(x2, prev_state=t1, prev_memory=n1)
    t2 = jax.block_until_ready(t2)

    q1, qm1 = _reference_forward(params, x1, zeros_state, None, K, jnp.bfloat16)
    q2, _ = _reference_forward(params, x2, q1, qm1, K, jnp.bfloat16)
    assert jnp.allclose(t1, q1, atol=2e-2, rtol=2e-2)
    assert jnp.allclose(t2, q2, atol=2e-2, rtol=2e-2)

    print("KERNEL_OK")
</pallas_src>

<mosaic_0001>
module attributes {stable_mosaic.version = 11 : i64} {
  func.func @_delta_conv_gru_kernel(%arg0: i32, %arg1: memref<1x36x256xf32, #tpu.memory_space<vmem>>, %arg2: memref<1x72x256xf32, #tpu.memory_space<vmem>>, %arg3: memref<1x8x256xf32, #tpu.memory_space<vmem>>, %arg4: memref<24x36xf32, #tpu.memory_space<vmem>>, %arg5: memref<24x72xf32, #tpu.memory_space<vmem>>, %arg6: memref<32x1xf32, #tpu.memory_space<vmem>>, %arg7: memref<1x8x256xf32, #tpu.memory_space<vmem>>, %arg8: memref<1x8x256xf32, #tpu.memory_space<vmem>>, %arg9: memref<1x8x256xf32, #tpu.memory_space<vmem>>, %arg10: memref<1x8x256xf32, #tpu.memory_space<vmem>>, %arg11: memref<1x8x256xf32, #tpu.memory_space<vmem>>) attributes {dimension_semantics = [#tpu.dimension_semantics<parallel>], iteration_bounds = array<i64: 2>, scalar_prefetch = 0 : i64, scratch_operands = 0 : i64, tpu.core_type = #tpu.core_type<tc>, window_params = [{transform_indices = @transform_0, window_bounds = array<i64: 1, 36, 256>}, {transform_indices = @transform_1, window_bounds = array<i64: 1, 72, 256>}, {transform_indices = @transform_2, window_bounds = array<i64: 1, 8, 256>}, {pipeline_mode = #tpu.pipeline_mode<synchronous>, transform_indices = @transform_3, window_bounds = array<i64: 24, 36>}, {pipeline_mode = #tpu.pipeline_mode<synchronous>, transform_indices = @transform_4, window_bounds = array<i64: 24, 72>}, {pipeline_mode = #tpu.pipeline_mode<synchronous>, transform_indices = @transform_5, window_bounds = array<i64: 32, 1>}, {transform_indices = @transform_6, window_bounds = array<i64: 1, 8, 256>}, {transform_indices = @transform_7, window_bounds = array<i64: 1, 8, 256>}, {transform_indices = @transform_8, window_bounds = array<i64: 1, 8, 256>}, {transform_indices = @transform_9, window_bounds = array<i64: 1, 8, 256>}, {transform_indices = @transform_10, window_bounds = array<i64: 1, 8, 256>}]} {
    %c0 = arith.constant 0 : index
    %c0_0 = arith.constant 0 : index
    %0 = vector.load %arg4[%c0, %c0_0] : memref<24x36xf32, #tpu.memory_space<vmem>>, vector<24x36xf32>
    %c0_1 = arith.constant 0 : index
    %c0_2 = arith.constant 0 : index
    %c0_3 = arith.constant 0 : index
    %1 = vector.load %arg1[%c0_1, %c0_2, %c0_3] : memref<1x36x256xf32, #tpu.memory_space<vmem>>, vector<1x36x256xf32>
    %2 = vector.shape_cast %1 : vector<1x36x256xf32> to vector<36x256xf32>
    %cst = arith.constant dense<0.000000e+00> : vector<24x256xf32>
    %3 = tpu.matmul %0, %2, %cst {dimension_numbers = #tpu.dot_dimension_numbers<[1], [0], [0], [1], [0, 0, 1, 1], [], []>} : vector<24x36xf32>, vector<36x256xf32>, vector<24x256xf32> -> vector<24x256xf32>
    %c0_4 = arith.constant 0 : index
    %c0_5 = arith.constant 0 : index
    %4 = vector.load %arg5[%c0_4, %c0_5] : memref<24x72xf32, #tpu.memory_space<vmem>>, vector<24x72xf32>
    %c0_6 = arith.constant 0 : index
    %c0_7 = arith.constant 0 : index
    %c0_8 = arith.constant 0 : index
    %5 = vector.load %arg2[%c0_6, %c0_7, %c0_8] : memref<1x72x256xf32, #tpu.memory_space<vmem>>, vector<1x72x256xf32>
    %6 = vector.shape_cast %5 : vector<1x72x256xf32> to vector<72x256xf32>
    %cst_9 = arith.constant dense<0.000000e+00> : vector<24x256xf32>
    %7 = tpu.matmul %4, %6, %cst_9 {dimension_numbers = #tpu.dot_dimension_numbers<[1], [0], [0], [1], [0, 0, 1, 1], [], []>} : vector<24x72xf32>, vector<72x256xf32>, vector<24x256xf32> -> vector<24x256xf32>
    %c0_10 = arith.constant 0 : index
    %c0_11 = arith.constant 0 : index
    %8 = vector.load %arg6[%c0_10, %c0_11] : memref<32x1xf32, #tpu.memory_space<vmem>>, vector<32x1xf32>
    %9 = vector.extract_strided_slice %3 {offsets = [0, 0], sizes = [8, 256], strides = [1, 1]} : vector<24x256xf32> to vector<8x256xf32>
    %10 = vector.extract_strided_slice %7 {offsets = [0, 0], sizes = [8, 256], strides = [1, 1]} : vector<24x256xf32> to vector<8x256xf32>
    %11 = arith.addf %9, %10 : vector<8x256xf32>
    %12 = vector.extract_strided_slice %8 {offsets = [0, 0], sizes = [8, 1], strides = [1, 1]} : vector<32x1xf32> to vector<8x1xf32>
    %13 = vector.broadcast %12 : vector<8x1xf32> to vector<8x256xf32>
    %14 = arith.addf %11, %13 : vector<8x256xf32>
    %15 = vector.extract_strided_slice %3 {offsets = [8, 0], sizes = [8, 256], strides = [1, 1]} : vector<24x256xf32> to vector<8x256xf32>
    %16 = vector.extract_strided_slice %7 {offsets = [8, 0], sizes = [8, 256], strides = [1, 1]} : vector<24x256xf32> to vector<8x256xf32>
    %17 = arith.addf %15, %16 : vector<8x256xf32>
    %18 = vector.extract_strided_slice %8 {offsets = [8, 0], sizes = [8, 1], strides = [1, 1]} : vector<32x1xf32> to vector<8x1xf32>
    %19 = vector.broadcast %18 : vector<8x1xf32> to vector<8x256xf32>
    %20 = arith.addf %17, %19 : vector<8x256xf32>
    %21 = vector.extract_strided_slice %3 {offsets = [16, 0], sizes = [8, 256], strides = [1, 1]} : vector<24x256xf32> to vector<8x256xf32>
    %22 = vector.extract_strided_slice %8 {offsets = [16, 0], sizes = [8, 1], strides = [1, 1]} : vector<32x1xf32> to vector<8x1xf32>
    %23 = vector.broadcast %22 : vector<8x1xf32> to vector<8x256xf32>
    %24 = arith.addf %21, %23 : vector<8x256xf32>
    %25 = vector.extract_strided_slice %7 {offsets = [16, 0], sizes = [8, 256], strides = [1, 1]} : vector<24x256xf32> to vector<8x256xf32>
    %26 = vector.extract_strided_slice %8 {offsets = [24, 0], sizes = [8, 1], strides = [1, 1]} : vector<32x1xf32> to vector<8x1xf32>
    %27 = vector.broadcast %26 : vector<8x1xf32> to vector<8x256xf32>
    %28 = arith.addf %25, %27 : vector<8x256xf32>
    %29 = arith.negf %14 : vector<8x256xf32>
    %30 = math.exp %29 : vector<8x256xf32>
    %cst_12 = arith.constant 1.000000e+00 : f32
    %31 = vector.broadcast %cst_12 : f32 to vector<8x256xf32>
    %32 = arith.addf %31, %30 : vector<8x256xf32>
    %33 = arith.divf %31, %32 : vector<8x256xf32>
    %34 = arith.negf %20 : vector<8x256xf32>
    %35 = math.exp %34 : vector<8x256xf32>
    %cst_13 = arith.constant 1.000000e+00 : f32
    %36 = vector.broadcast %cst_13 : f32 to vector<8x256xf32>
    %37 = arith.addf %36, %35 : vector<8x256xf32>
    %38 = arith.divf %36, %37 : vector<8x256xf32>
    %39 = arith.mulf %38, %28 : vector<8x256xf32>
    %40 = arith.addf %24, %39 : vector<8x256xf32>
    %41 = math.tanh %40 : vector<8x256xf32>
    %c0_14 = arith.constant 0 : index
    %c0_15 = arith.constant 0 : index
    %c0_16 = arith.constant 0 : index
    %42 = vector.load %arg3[%c0_14, %c0_15, %c0_16] : memref<1x8x256xf32, #tpu.memory_space<vmem>>, vector<1x8x256xf32>
    %43 = vector.shape_cast %42 : vector<1x8x256xf32> to vector<8x256xf32>
    %cst_17 = arith.constant 1.000000e+00 : f32
    %44 = vector.broadcast %cst_17 : f32 to vector<8x256xf32>
    %45 = arith.subf %44, %33 : vector<8x256xf32>
    %46 = arith.mulf %43, %45 : vector<8x256xf32>
    %47 = arith.mulf %41, %33 : vector<8x256xf32>
    %48 = arith.addf %46, %47 : vector<8x256xf32>
    %c0_18 = arith.constant 0 : index
    %c0_19 = arith.constant 0 : index
    %c0_20 = arith.constant 0 : index
    %49 = vector.load %arg7[%c0_18, %c0_19, %c0_20] : memref<1x8x256xf32, #tpu.memory_space<vmem>>, vector<1x8x256xf32>
    %50 = vector.shape_cast %49 : vector<1x8x256xf32> to vector<8x256xf32>
    %51 = vector.shape_cast %48 : vector<8x256xf32> to vector<1x8x256xf32>
    tpu.vector_store %arg7[%c0_18, %c0_19, %c0_20], %51 {strides = array<i32>} : memref<1x8x256xf32, #tpu.memory_space<vmem>>, vector<1x8x256xf32>,
    %c0_21 = arith.constant 0 : index
    %c0_22 = arith.constant 0 : index
    %c0_23 = arith.constant 0 : index
    %52 = vector.load %arg8[%c0_21, %c0_22, %c0_23] : memref<1x8x256xf32, #tpu.memory_space<vmem>>, vector<1x8x256xf32>
    %53 = vector.shape_cast %52 : vector<1x8x256xf32> to vector<8x256xf32>
    %54 = vector.shape_cast %14 : vector<8x256xf32> to vector<1x8x256xf32>
    tpu.vector_store %arg8[%c0_21, %c0_22, %c0_23], %54 {strides = array<i32>} : memref<1x8x256xf32, #tpu.memory_space<vmem>>, vector<1x8x256xf32>,
    %c0_24 = arith.constant 0 : index
    %c0_25 = arith.constant 0 : index
    %c0_26 = arith.constant 0 : index
    %55 = vector.load %arg9[%c0_24, %c0_25, %c0_26] : memref<1x8x256xf32, #tpu.memory_space<vmem>>, vector<1x8x256xf32>
    %56 = vector.shape_cast %55 : vector<1x8x256xf32> to vector<8x256xf32>
    %57 = vector.shape_cast %20 : vector<8x256xf32> to vector<1x8x256xf32>
    tpu.vector_store %arg9[%c0_24, %c0_25, %c0_26], %57 {strides = array<i32>} : memref<1x8x256xf32, #tpu.memory_space<vmem>>, vector<1x8x256xf32>,
    %c0_27 = arith.constant 0 : index
    %c0_28 = arith.constant 0 : index
    %c0_29 = arith.constant 0 : index
    %58 = vector.load %arg10[%c0_27, %c0_28, %c0_29] : memref<1x8x256xf32, #tpu.memory_space<vmem>>, vector<1x8x256xf32>
    %59 = vector.shape_cast %58 : vector<1x8x256xf32> to vector<8x256xf32>
    %60 = vector.shape_cast %24 : vector<8x256xf32> to vector<1x8x256xf32>
    tpu.vector_store %arg10[%c0_27, %c0_28, %c0_29], %60 {strides = array<i32>} : memref<1x8x256xf32, #tpu.memory_space<vmem>>, vector<1x8x256xf32>,
    %c0_30 = arith.constant 0 : index
    %c0_31 = arith.constant 0 : index
    %c0_32 = arith.constant 0 : index
    %61 = vector.load %arg11[%c0_30, %c0_31, %c0_32] : memref<1x8x256xf32, #tpu.memory_space<vmem>>, vector<1x8x256xf32>
    %62 = vector.shape_cast %61 : vector<1x8x256xf32> to vector<8x256xf32>
    %63 = vector.shape_cast %28 : vector<8x256xf32> to vector<1x8x256xf32>
    tpu.vector_store %arg11[%c0_30, %c0_31, %c0_32], %63 {strides = array<i32>} : memref<1x8x256xf32, #tpu.memory_space<vmem>>, vector<1x8x256xf32>,
    return
  }
  func.func @transform_0(%arg0: i32) -> (i32, i32, i32) {
    %c0_i32 = arith.constant 0 : i32
    %c0_i32_0 = arith.constant 0 : i32
    %c0_i32_1 = arith.constant 0 : i32
    return %arg0, %c0_i32, %c0_i32_0 : i32, i32, i32
  }
  func.func @transform_1(%arg0: i32) -> (i32, i32, i32) {
    %c0_i32 = arith.constant 0 : i32
    %c0_i32_0 = arith.constant 0 : i32
    %c0_i32_1 = arith.constant 0 : i32
    return %arg0, %c0_i32, %c0_i32_0 : i32, i32, i32
  }
  func.func @transform_2(%arg0: i32) -> (i32, i32, i32) {
    %c0_i32 = arith.constant 0 : i32
    %c0_i32_0 = arith.constant 0 : i32
    %c0_i32_1 = arith.constant 0 : i32
    return %arg0, %c0_i32, %c0_i32_0 : i32, i32, i32
  }
  func.func @transform_3(%arg0: i32) -> (i32, i32) {
    %c0_i32 = arith.constant 0 : i32
    %c0_i32_0 = arith.constant 0 : i32
    %c0_i32_1 = arith.constant 0 : i32
    return %c0_i32, %c0_i32_0 : i32, i32
  }
  func.func @transform_4(%arg0: i32) -> (i32, i32) {
    %c0_i32 = arith.constant 0 : i32
    %c0_i32_0 = arith.constant 0 : i32
    %c0_i32_1 = arith.constant 0 : i32
    return %c0_i32, %c0_i32_0 : i32, i32
  }
  func.func @transform_5(%arg0: i32) -> (i32, i32) {
    %c0_i32 = arith.constant 0 : i32
    %c0_i32_0 = arith.constant 0 : i32
    %c0_i32_1 = arith.constant 0 : i32
    return %c0_i32, %c0_i32_0 : i32, i32
  }
  func.func @transform_6(%arg0: i32) -> (i32, i32, i32) {
    %c0_i32 = arith.constant 0 : i32
    %c0_i32_0 = arith.constant 0 : i32
    %c0_i32_1 = arith.constant 0 : i32
    return %arg0, %c0_i32, %c0_i32_0 : i32, i32, i32
  }
  func.func @transform_7(%arg0: i32) -> (i32, i32, i32) {
    %c0_i32 = arith.constant 0 : i32
    %c0_i32_0 = arith.constant 0 : i32
    %c0_i32_1 = arith.constant 0 : i32
    return %arg0, %c0_i32, %c0_i32_0 : i32, i32, i32
  }
  func.func @transform_8(%arg0: i32) -> (i32, i32, i32) {
    %c0_i32 = arith.constant 0 : i32
    %c0_i32_0 = arith.constant 0 : i32
    %c0_i32_1 = arith.constant 0 : i32
    return %arg0, %c0_i32, %c0_i32_0 : i32, i32, i32
  }
  func.func @transform_9(%arg0: i32) -> (i32, i32, i32) {
    %c0_i32 = arith.constant 0 : i32
    %c0_i32_0 = arith.constant 0 : i32
    %c0_i32_1 = arith.constant 0 : i32
    return %arg0, %c0_i32, %c0_i32_0 : i32, i32, i32
  }
  func.func @transform_10(%arg0: i32) -> (i32, i32, i32) {
    %c0_i32 = arith.constant 0 : i32
    %c0_i32_0 = arith.constant 0 : i32
    %c0_i32_1 = arith.constant 0 : i32
    return %arg0, %c0_i32, %c0_i32_0 : i32, i32, i32
  }
}

</mosaic_0001>

<bundles_post_ra>
// kernel: tpu_custom_call.1
= control target key start
LH: loop header
LB: loop body
LE: loop exit
PB: predicated region body
PF: predicated region fallthrough
CT: control target
= control target key end

     0   :  { %s2440_s0 = inlined_call_operand.hbm [shape: f32[2,36,256], index: 0, kind: input, shape index: {}]   ;;  %s2441_s1 = inlined_call_operand.hbm [shape: f32[2,72,256], index: 1, kind: input, shape index: {}]   ;;  %s2442_s2 = inlined_call_operand.hbm [shape: f32[2,8,256], index: 2, kind: input, shape index: {}]   ;;  %s2443_s3 = inlined_call_operand.hbm [shape: f32[24,36], index: 3, kind: input, shape index: {}]   ;;  %s2444_s4 = inlined_call_operand.hbm [shape: f32[24,72], index: 4, kind: input, shape index: {}]   ;;  %s2445_s5 = inlined_call_operand.hbm [shape: f32[32,1], index: 5, kind: input, shape index: {}]   ;;  %s2446_s6 = inlined_call_operand.hbm [shape: f32[2,8,256], index: 6, kind: output, shape index: {0}]   ;;  %s2447_s7 = inlined_call_operand.hbm [shape: f32[2,8,256], index: 7, kind: output, shape index: {1}]   ;;  %s2448_s8 = inlined_call_operand.hbm [shape: f32[2,8,256], index: 8, kind: output, shape index: {2}]   ;;  %s2449_s9 = inlined_call_operand.hbm [shape: f32[2,8,256], index: 9, kind: output, shape index: {3}]   ;;  %s2450_s10 = inlined_call_operand.hbm [shape: f32[2,8,256], index: 10, kind: output, shape index: {4}]  }
   0x1   :  { %2479 = sst [smem:[#allocation33_spill]] %s2441_s1 }
   0x2   :  { %2480 = sst [smem:[#allocation34_spill]] %s2443_s3 }
   0x3   :  { %2481 = sst [smem:[#allocation35_spill]] %s2446_s6 }
   0x4   :  { %2482 = sst [smem:[#allocation36_spill]] %s2448_s8 }
   0x5   :  { %2483 = sst [smem:[#allocation37_spill]] %s2449_s9 }
   0x6   :  { %2484 = sst [smem:[#allocation38_spill]] %s2450_s10 }
   0x7   :  { %16 = vsyncpa [#allocation3], 0 }
   0x8   :  { %18 = vsyncpa [#allocation3 + $0x1], 0 }
   0x9   :  { %19 = vsyncpa [#allocation6], 0 }
   0xa   :  { %21 = vsyncpa [#allocation6 + $0x1], 0 }
   0xb   :  { %22 = vsyncpa [#allocation9], 0 }
   0xc   :  { %23 = vsyncpa [#allocation12], 0 }
   0xd   :  { %24 = vsyncpa [#allocation4], 0 }
   0xe   :  { %26 = vsyncpa [#allocation4 + $0x1], 0 }
   0xf   :  { %27 = vsyncpa [#allocation15], 0 }
  0x10   :  { %29 = vsyncpa [#allocation15 + $0x1], 0 }
  0x11   :  { %30 = vsyncpa [#allocation18], 0 }
  0x12   :  { %32 = vsyncpa [#allocation18 + $0x1], 0  ;;  %s1871_s13 = smov 0   ;;  %s1873_s14 = smov 0  }
  0x13   :  { %s1875_s15 = smov 0   ;;  %s1877_s16 = smov 0  }
  0x14 LB: > { %2485 = sst [smem:[#allocation27_spill]] %s1785_s13  ;;  %s1892_s17 = sadd.s32 4294967295, %s1797_s16   ;;  %s1797_s16 = sphi %s1877_s16, %s2531_s16   ;;  %s1793_s15 = sphi %s1875_s15, %s2533_s15   ;;  %s1789_s14 = sphi %s1873_s14, %s2535_s14   ;;  %s1785_s13 = sphi %s1871_s13, %s2534_s13  }
  0x15   : > { %2486 = sst [smem:[#allocation28_spill]] %s1793_s15  ;;  %s2451_s18 = sadd.s32 4294967294, %s1797_s16  }
  0x16   : > { %s1896_s19 = sadd.s32 1, %s1797_s16   ;;  %s45_s20 = sadd.s32 1, %s1793_s15 }
  0x17   : > { %2487 = sst [smem:[#allocation29_spill]] %s1896_s19  ;;  %s42_s21 = ssub.s32 %s1797_s16, %s1896_s19 }
  0x18   : > { %p52_p0 = scmp.ne.s32.totalorder %s1793_s15, %s1789_s14  ;;  %p43_p1 = scmp.eq.s32.totalorder %s42_s21, 0 }
  0x19   : > { %p53_p2 = scmp.eq.s32.totalorder %s1797_s16, 0  ;;  %p58_p3 = scmp.ne.s32.totalorder %s1789_s14, %s1785_s13 }
  0x1a   : > { %p2455_p4 = scmp.eq.s32.totalorder %s1892_s17, 0  ;;  %p197_p7 = scmp.eq.s32.totalorder %s1892_s17, 1 }
  0x1b   : > { %s1908_s22 = scalar_select %p43_p1, %s1793_s15, %s45_s20  }
  0x1c   : > { %p1910_p5 = por %p53_p2, %p52_p0  ;;  %p1916_p6 = por %p2455_p4, %p58_p3 }
  0x1d   : > { %2488 = sst [smem:[#allocation30_spill]] %s1908_s22  ;;  %p203_p8 = scmp.eq.s32.totalorder %s2451_s18, 1 }
  0x1e   : > { %s2489_s23 = scalar_select %p1910_p5, 1, 0 }
  0x1f   : > { %s2490_s24 = scalar_select %p1916_p6, 1, 0 }
  0x20   : > { %p1201_p9 = scmp.ge.s32.totalorder %s1797_s16, 1  ;;  %p314_p10 = scmp.lt.s32.totalorder %s1797_s16, 3 }
  0x21   : > { %p1925_p11 = por %p197_p7, %p52_p0  ;;  %p1929_p12 = por %p203_p8, %p58_p3 }
  0x22   : > { %p1933_p13 = pnand %p1201_p9, %p314_p10  ;;  %s1799_s28 = smov [#allocation8]  }
  0x23   : > { %s2491_s25 = scalar_select %p1925_p11, 1, 0 }
  0x24   : > { %s2493_s26 = scalar_select %p1929_p12, 1, 0 }
  0x25   : > { %2492 = sst [smem:[#allocation31_spill]] %s2491_s25  ;;  %p1318_p1 = pneg %p1933_p13 }
  0x26   : > { %2494 = sst [smem:[#allocation32_spill]] %s2493_s26  ;;  %s326_s29 = sshll.u32 %s1799_s28, 4  ;;  %s327_s29 = int_to_ptr.vmem [resolvable:$true] %s326_s29 }
  0x27   : > { %s2495_s27 = scalar_select %p1933_p13, 1, 0 }
  0x28   : > { %p1941_p2 = pnand %p1318_p1, %p2455_p4  ;;  %s1948_s11 = sand.u32 1, %s1793_s15  }
  0x29   : > { %s2497_s3 = sld [smem:[#allocation34_spill]] }
  0x2a   : > { %s2496_s30 = scalar_select %p1941_p2, 1, 0 }
  0x2b   : > { %p1958_p8 = pneg %p1941_p2 }
  0x2d   : > { %s2498_s28 = scalar_select %p1958_p8, 1, 0 }
  0x2f   : > { %s1425_s21 = scalar_lea.hbm %s2497_s3, 384 }
  0x30   : > { %p1426_p7 = scmp.ne.s32.totalorder %s2497_s3, %s1425_s21  ;;  %p1432_p1 = scmp.lt.u32.totalorder %s1425_s21, %s2497_s3 }
  0x32   : > { %p1428_p9 = pnand %p1958_p8, %p1426_p7 }
  0x34   : > { %p1429_p10 = pneg %p1428_p9 }
  0x36   : > { %p1434_p0 = pnand %p1432_p1, %p1429_p10 }
  0x38   : > { %1437 = shalt.err (!%p1434_p0)
}
  0x39   : > { %s1438_s12 = scalar_lea.vmem %s327_s29, 384  ;;  %p1446_p11 = scmp.lt.s32.totalorder %s327_s29, %s327_s29 }
  0x3a   : > { %p1439_p4 = scmp.ne.s32.totalorder %s327_s29, %s1438_s12  ;;  %p1447_p6 = scmp.lt.s32.totalorder %s1438_s12, %s1438_s12 }
  0x3c   : > { %p1441_p3 = pnand %p1439_p4, %p1958_p8  ;;  %p1448_p13 = por %p1447_p6, %p1446_p11 }
  0x3e   : > { %p1442_p12 = pneg %p1441_p3 }
  0x40   : > { %p1449_p5 = pnand %p1448_p13, %p1442_p12 }
  0x42   : > { %1452 = shalt.err (!%p1449_p5)
}
  0x43   : > { %s2469_s18 = smov 128   ;;  %s2471_s15 = smov 8  }
  0x44   : > { %1321 = dma.hbm_to_vmem [thread:$0]  (!%p1941_p2), %s2497_s3, 384, %s327_s29, [#allocation9], %s2469_s18, %s2469_s18, %s2471_s15  }
  0x45   : > { %p2499_p4 = scmp.ne.s32.totalorder %s2489_s23, 0  ;;  %p2500_p6 = scmp.lt.s32.totalorder %s1797_s16, 2 }
  0x46   : > { %s387_s21 = sand.u32 1, %s1797_s16   ;;  %s1286_s12 = smul.u32 144, %s1948_s11 }
  0x47   : > { %p1981_p11 = pnand %p2500_p6, %p2499_p4  ;;  %s1287_s26 = smul.u32 2304, %s1797_s16 }
  0x48   : > { %s391_s13 = scalar_lea.vmem [#allocation5], %s1286_s12  ;;  %s2502_s1 = sld [smem:[#allocation33_spill]] }
  0x49   : > { %s2501_s20 = scalar_select %p1981_p11, 1, 0 }
  0x4a   : > { %s398_s6 = sshll.u32 %s391_s13, 4  ;;  %s1995_s23 = scalar_lea.sflag [#allocation6], %s387_s21  ;;  %s1993_s6 = int_to_ptr.vmem [resolvable:$true] %s398_s6 }
  0x4b   : > { %p2001_p12 = pneg %p1981_p11 }
  0x4d   : > { %s2503_s19 = scalar_select %p2001_p12, 1, 0 }
  0x4e   : > { %s1991_s9 = scalar_lea.hbm %s2502_s1, %s1287_s26  ;;  %s1458_s13 = scalar_lea.hbm %s2502_s1, 4608 }
  0x4f   : > { %s1453_s29 = scalar_lea.hbm %s1991_s9, 2304  ;;  %p1459_p3 = scmp.lt.u32.totalorder %s1991_s9, %s2502_s1 }
  0x50   : > { %p1454_p5 = scmp.ne.s32.totalorder %s1991_s9, %s1453_s29  ;;  %p1460_p7 = scmp.lt.u32.totalorder %s1458_s13, %s1453_s29 }
  0x51   : > { %p1462_p10 = scmp.lt.u32.totalorder %s1453_s29, %s1991_s9 }
  0x52   : > { %p1456_p13 = pnand %p2001_p12, %p1454_p5  ;;  %p1461_p9 = por %p1460_p7, %p1459_p3 }
  0x54   : > { %p1457_p0 = pneg %p1456_p13  ;;  %p1463_p1 = por %p1462_p10, %p1461_p9 }
  0x56   : > { %p1464_p4 = pnand %p1463_p1, %p1457_p0 }
  0x58   : > { %1467 = shalt.err (!%p1464_p4)
}
  0x59   : > { %s1468_s21 = scalar_lea.vmem %s1993_s6, 2304  ;;  %s1802_s12 = smov [#allocation5]  }
  0x5a   : > { %p1469_p6 = scmp.ne.s32.totalorder %s1993_s6, %s1468_s21  ;;  %s1473_s8 = sshll.u32 %s1802_s12, 4  ;;  %s1474_s8 = int_to_ptr.vmem [resolvable:$false] %s1473_s8 }
  0x5b   : > { %s1475_s10 = scalar_lea.vmem %s1474_s8, 4608  ;;  %p1476_p2 = scmp.lt.s32.totalorder %s1993_s6, %s1474_s8 }
  0x5c   : > { %p1471_p5 = pnand %p1469_p6, %p2001_p12  ;;  %p1477_p8 = scmp.lt.s32.totalorder %s1475_s10, %s1468_s21 }
  0x5e   : > { %p1472_p13 = pneg %p1471_p5  ;;  %p1478_p3 = por %p1477_p8, %p1476_p2 }
  0x60   : > { %p1479_p7 = pnand %p1478_p3, %p1472_p13 }
  0x62   : > { %1482 = shalt.err (!%p1479_p7)
}
  0x63   : > { %s1803_s29 = smov 256   ;;  %s1804_s13 = smov 16  }
  0x64   : > { %1334 = dma.hbm_to_vmem [thread:$0]  (!%p1981_p11), %s1991_s9, 2304, %s1993_s6, %s1995_s23, %s1803_s29, %s1803_s29, %s1804_s13  }
  0x65   : > { %s1805_s26 = smov [#allocation10]   ;;  %s1806_s12 = smov [#allocation11]  }
  0x66   : > { %s339_s22 = sshll.u32 %s1805_s26, 4  ;;  %s352_s21 = sshll.u32 %s1806_s12, 4  ;;  %s340_s22 = int_to_ptr.vmem [resolvable:$true] %s339_s22  ;;  %s353_s21 = int_to_ptr.vmem [resolvable:$true] %s352_s21 }
  0x67   : > { %s1483_s18 = scalar_lea.hbm %s2444_s4, 384  ;;  %p2504_p8 = scmp.ne.s32.totalorder %s2498_s28, 0 }
  0x68   : > { %p1484_p2 = scmp.ne.s32.totalorder %s2444_s4, %s1483_s18  ;;  %p1490_p10 = scmp.lt.u32.totalorder %s1483_s18, %s2444_s4 }
  0x6a   : > { %p1486_p0 = pnand %p1484_p2, %p2504_p8 }
  0x6c   : > { %p1487_p9 = pneg %p1486_p0 }
  0x6e   : > { %p1492_p1 = pnand %p1490_p10, %p1487_p9 }
  0x70   : > { %1495 = shalt.err (!%p1492_p1)
}
  0x71   : > { %s1496_s6 = scalar_lea.vmem %s340_s22, 384  ;;  %p1504_p13 = scmp.lt.s32.totalorder %s340_s22, %s340_s22 }
  0x72   : > { %p1497_p4 = scmp.ne.s32.totalorder %s340_s22, %s1496_s6  ;;  %p1505_p3 = scmp.lt.s32.totalorder %s1496_s6, %s1496_s6 }
  0x74   : > { %p1499_p6 = pnand %p1497_p4, %p2504_p8  ;;  %p1506_p7 = por %p1505_p3, %p1504_p13 }
  0x76   : > { %p1500_p5 = pneg %p1499_p6 }
  0x78   : > { %p1507_p11 = pnand %p1506_p7, %p1500_p5 }
  0x7a   : > { %1510 = shalt.err (!%p1507_p11)
}
  0x7b   : > { %p2505_p2 = scmp.ne.s32.totalorder %s2496_s30, 0  ;;  %s2506_s1 = smov 8  }
  0x7c   : > { %s2507_s9 = smov 128   ;;  %s1511_s26 = scalar_lea.hbm %s2445_s5, 512 }
  0x7d   : > { %1324 = dma.hbm_to_vmem [thread:$0]  (!%p2505_p2), %s2444_s4, 384, %s340_s22, [#allocation9], %s2507_s9, %s2507_s9, %s2506_s1  }
  0x7e   : > { %p1512_p0 = scmp.ne.s32.totalorder %s2445_s5, %s1511_s26  ;;  %p1518_p10 = scmp.lt.u32.totalorder %s1511_s26, %s2445_s5 }
  0x80   : > { %p1514_p11 = pnand %p1512_p0, %p2504_p8 }
  0x82   : > { %p1515_p9 = pneg %p1514_p11 }
  0x84   : > { %p1520_p1 = pnand %p1518_p10, %p1515_p9 }
  0x86   : > { %1523 = shalt.err (!%p1520_p1)
}
  0x87   : > { %s1524_s3 = scalar_lea.vmem %s353_s21, 512  ;;  %p1532_p13 = scmp.lt.s32.totalorder %s353_s21, %s353_s21 }
  0x88   : > { %p1525_p4 = scmp.ne.s32.totalorder %s353_s21, %s1524_s3  ;;  %p1533_p3 = scmp.lt.s32.totalorder %s1524_s3, %s1524_s3 }
  0x8a   : > { %p1527_p6 = pnand %p1525_p4, %p2504_p8  ;;  %p1534_p7 = por %p1533_p3, %p1532_p13 }
  0x8c   : > { %p1528_p5 = pneg %p1527_p6 }
  0x8e   : > { %p1535_p12 = pnand %p1534_p7, %p1528_p5 }
  0x90   : > { %1538 = shalt.err (!%p1535_p12)
}
  0x91   : > { %1327 = dma.hbm_to_vmem [thread:$0]  (!%p2505_p2), %s2445_s5, 512, %s353_s21, [#allocation12], %s2507_s9, %s2507_s9, %s2506_s1  }
  0x92   : > { %s1284_s28 = smul.u32 80, %s1948_s11  ;;  %s1208_s18 = sshll.u32 %s1948_s11, 4 }
  0x93   : > { %s1285_s15 = smul.u32 1280, %s1797_s16  ;;  %s1250_s26 = sshll.u32 %s1797_s16, 8 }
  0x94   : > { %s370_s10 = scalar_lea.vmem [#allocation2], %s1284_s28  ;;  %s2084_s21 = scalar_lea.hbm %s2442_s2, %s1250_s26 }
  0x95   : > { %s2077_s30 = scalar_lea.hbm %s2440_s0, %s1285_s15  ;;  %s377_s6 = sshll.u32 %s370_s10, 4  ;;  %s2079_s6 = int_to_ptr.vmem [resolvable:$true] %s377_s6 }
  0x96   : > { %s367_s1 = scalar_lea.sflag [#allocation3], %s1948_s11  ;;  %s1539_s9 = scalar_lea.hbm %s2077_s30, 1280 }
  0x97   : > { %p1540_p12 = scmp.ne.s32.totalorder %s2077_s30, %s1539_s9  ;;  %p2508_p8 = scmp.ne.s32.totalorder %s2503_s19, 0 }
  0x98   : > { %s1544_s12 = scalar_lea.hbm %s2440_s0, 2560  ;;  %p1545_p11 = scmp.lt.u32.totalorder %s2077_s30, %s2440_s0 }
  0x99   : > { %p1542_p2 = pnand %p1540_p12, %p2508_p8  ;;  %p1546_p9 = scmp.lt.u32.totalorder %s1544_s12, %s1539_s9 }
  0x9a   : > { %p1548_p1 = scmp.lt.u32.totalorder %s1539_s9, %s2077_s30 }
  0x9b   : > { %p1543_p0 = pneg %p1542_p2  ;;  %p1547_p10 = por %p1546_p9, %p1545_p11 }
  0x9d   : > { %p1549_p4 = por %p1548_p1, %p1547_p10 }
  0x9f   : > { %p1550_p6 = pnand %p1549_p4, %p1543_p0 }
  0xa1   : > { %1553 = shalt.err (!%p1550_p6)
}
  0xa2   : > { %s1554_s26 = scalar_lea.vmem %s2079_s6, 1280  ;;  %s1807_s10 = smov [#allocation2]  }
  0xa3   : > { %p1555_p5 = scmp.ne.s32.totalorder %s2079_s6, %s1554_s26  ;;  %s1559_s3 = sshll.u32 %s1807_s10, 4  ;;  %s1560_s3 = int_to_ptr.vmem [resolvable:$false] %s1559_s3 }
  0xa4   : > { %s1561_s22 = scalar_lea.vmem %s1560_s3, 2560  ;;  %p1562_p7 = scmp.lt.s32.totalorder %s2079_s6, %s1560_s3 }
  0xa5   : > { %p1557_p13 = pnand %p1555_p5, %p2508_p8  ;;  %p1563_p12 = scmp.lt.s32.totalorder %s1561_s22, %s1554_s26 }
  0xa7   : > { %p1558_p3 = pneg %p1557_p13  ;;  %p1564_p2 = por %p1563_p12, %p1562_p7 }
  0xa9   : > { %p1565_p11 = pnand %p1564_p2, %p1558_p3 }
  0xab   : > { %1568 = shalt.err (!%p1565_p11)
}
  0xac   : > { %p2509_p0 = scmp.ne.s32.totalorder %s2501_s20, 0  ;;  %s412_s9 = scalar_lea.vmem [#allocation7], %s1208_s18 }
  0xad   : > { %s420_s25 = sshll.u32 %s412_s9, 4  ;;  %s1569_s15 = scalar_lea.hbm %s2084_s21, 256  ;;  %s421_s25 = int_to_ptr.vmem [resolvable:$true] %s420_s25 }
  0xae   : > { %1331 = dma.hbm_to_vmem [thread:$0]  (!%p2509_p0), %s2077_s30, 1280, %s2079_s6, %s367_s1, %s1803_s29, %s1803_s29, %s1804_s13  }
  0xaf   : > { %p1570_p9 = scmp.ne.s32.totalorder %s2084_s21, %s1569_s15  ;;  %s1574_s28 = scalar_lea.hbm %s2442_s2, 512 }
  0xb0   : > { %p1575_p4 = scmp.lt.u32.totalorder %s2084_s21, %s2442_s2  ;;  %p1576_p6 = scmp.lt.u32.totalorder %s1574_s28, %s1569_s15 }
  0xb1   : > { %p1572_p10 = pnand %p1570_p9, %p2508_p8  ;;  %p1578_p13 = scmp.lt.u32.totalorder %s1569_s15, %s2084_s21 }
  0xb2   : > { %p1577_p5 = por %p1576_p6, %p1575_p4 }
  0xb3   : > { %p1573_p1 = pneg %p1572_p10 }
  0xb4   : > { %p1579_p3 = por %p1578_p13, %p1577_p5 }
  0xb6   : > { %p1580_p7 = pnand %p1579_p3, %p1573_p1 }
  0xb8   : > { %1583 = shalt.err (!%p1580_p7)
}
  0xb9   : > { %s1584_s11 = scalar_lea.vmem %s421_s25, 256  ;;  %s1808_s29 = smov [#allocation7]  }
  0xba   : > { %p1585_p12 = scmp.ne.s32.totalorder %s421_s25, %s1584_s11  ;;  %s1589_s13 = sshll.u32 %s1808_s29, 4  ;;  %s1590_s13 = int_to_ptr.vmem [resolvable:$false] %s1589_s13 }
  0xbb   : > { %s1591_s18 = scalar_lea.vmem %s1590_s13, 512  ;;  %p1592_p9 = scmp.lt.s32.totalorder %s421_s25, %s1590_s13 }
  0xbc   : > { %p1587_p2 = pnand %p1585_p12, %p2508_p8  ;;  %p1593_p10 = scmp.lt.s32.totalorder %s1591_s18, %s1584_s11 }
  0xbe   : > { %p1588_p11 = pneg %p1587_p2  ;;  %p1594_p0 = por %p1593_p10, %p1592_p9 }
  0xc0   : > { %p1595_p4 = pnand %p1594_p0, %p1588_p11 }
  0xc2   : > { %1598 = shalt.err (!%p1595_p4)
}
  0xc3   : > { %p2510_p6 = scmp.ne.s32.totalorder %s2501_s20, 0  ;;  %p2511_p1 = scmp.ne.s32.totalorder %s2495_s27, 0 }
  0xc4   : > { %s2136_s19 = sand.u32 (!%p2511_p1), 1, %s1789_s14   ;;  %p2512_p8 = scmp.ne.s32.totalorder (!%p2511_p1), %s2490_s24, 0 }
  0xc5   : > { %1337 = dma.hbm_to_vmem [thread:$0]  (!%p2510_p6), %s2084_s21, 256, %s421_s25, %s1995_s23  }
  0xc6   : > { %429 = sbr.rel (%p2511_p1) target bundleno = 592 (0x250), region = 44  ;;  %s432_s6 = scalar_lea.sflag (!%p2511_p1), [#allocation3], %s2136_s19 }
  0xc7   : > { %s1288_s30 = smul.u32 (!%p2511_p1), 80, %s2136_s19 }
  0xc9   : > { %s2140_s1 = scalar_lea.vmem (!%p2511_p1), [#allocation2], %s1288_s30 }
  0xcd   : > { %1756 = dma.done.wait (%p2512_p8), %s432_s6, 1280  }
  0xce   : > { %1758 = vsyncadd (%p2512_p8), %s432_s6, 4294966016  ;;  %s2147_s27 = sand.u32 1, %s1892_s17   ;;  %s1289_s20 = smul.u32 144, %s2136_s19 }
  0xcf   : > { %s441_s23 = scalar_lea.sflag [#allocation6], %s2147_s27 }
  0xd0   : > { %s2151_s21 = scalar_lea.vmem [#allocation5], %s1289_s20 }
  0xd1   : > { %1760 = dma.done.wait (%p2512_p8), %s441_s23, 2560  }
  0xd2   : > { %1762 = vsyncadd (%p2512_p8), %s441_s23, 4294964736  ;;  %s2158_s3 = sshll.u32 %s2136_s19, 4  ;;  %p2513_p0 = scmp.eq.s32.totalorder %s1892_s17, 0 }
  0xd4   : > { %1764 = dma.done.wait (%p2513_p0), [#allocation9], 768   ;;  %p2514_p5 = pmov %p2513_p0 }
  0xd5   : > { %p2515_p13 = pmov %p2513_p0 }
  0xd6   : > { %1766 = vsyncadd (%p2514_p5), [#allocation9], 4294966528 }
  0xd7   : > { %1768 = dma.done.wait (%p2515_p13), [#allocation12], 512   ;;  %p2516_p3 = pmov %p2513_p0 }
  0xd8   : > { %v1809_v0 = vmov 0.0   ;;  %v1810_v1 = vmov 0   ;;  %v649_v2 = vld [vmem:[%s2151_s21 + $0x8] sm:$0xff]  ;;  %v651_v3 = vld [vmem:[%s2151_s21 + $0x18] sm:$0xff]  ;;  %v648_v4 = vld [vmem:[%s2151_s21] sm:$0xff]  ;;  %vm555_vm0 = vcmask 1043456  }
  0xd9   : > { %1770 = vsyncadd (%p2516_p3), [#allocation12], 4294966784  ;;  %626 = vmatprep.mubr.f32.mxu1 %v1809_v0  ;;  %740 = vmatprep.mubr.f32.mxu0 %v1809_v0  ;;  %v1264_v5 = vpack.c.bf16 %v651_v3, %v649_v2  ;;  %v650_v6 = vld [vmem:[%s2151_s21 + $0x10] sm:$0xff]  ;;  %v653_v7 = vld [vmem:[%s2151_s21 + $0x28] sm:$0xff]  ;;  %vm545_vm1 = vcmask 293888   ;;  %vm666_vm2 = vcmask 588800  }
  0xda   : > { %1403 = vset.pattern.permute.xlu0 %v1810_v1  ;;  %1404 = vset.pattern.permute.xlu1 %v1810_v1  ;;  %v655_v8 = vld [vmem:[%s2151_s21 + $0x38] sm:$0xff]  ;;  %v1266_v9 = vpack.c.bf16 %v650_v6, %v648_v4  ;;  %v652_v11 = vld [vmem:[%s2151_s21 + $0x20] sm:$0xff]  ;;  %v654_v12 = vld [vmem:[%s2151_s21 + $0x30] sm:$0xff]  ;;  %s2211_s24 = scalar_lea.vmem [#allocation16], %s2158_s3  ;;  %s2215_s25 = sshll.u32 %s1892_s17, 8 }
  0xdb   : > { %v1268_v10 = vpack.c.bf16 %v655_v8, %v653_v7  ;;  %v536_v13 = vld [vmem:[%s2140_s1 + $0x8] sm:$0xff]  ;;  %1265 = vmatprep.subr.bf16.mxu0 %v1264_v5  ;;  %v538_v14 = vld [vmem:[%s2140_s1 + $0x18] sm:$0xff]  ;;  %v535_v15 = vld [vmem:[%s2140_s1] sm:$0xff]  ;;  %v1270_v17 = vpack.c.bf16 %v654_v12, %v652_v11  ;;  %s908_s9 = sshll.u32 %s2211_s24, 4  ;;  %s510_s15 = scalar_lea.vmem [#allocation14], %s2158_s3  ;;  %s2258_s9 = int_to_ptr.vmem [resolvable:$true] %s908_s9 }
  0xdc   : > { %v537_v16 = vld [vmem:[%s2140_s1 + $0x10] sm:$0xff]  ;;  %1267 = vmatpush1.bf16.msra.mxu0 %v1266_v9  ;;  %v1256_v18 = vpack.c.bf16 %v538_v14, %v536_v13  ;;  %v657_v20 = vld [vmem:[%s2151_s21 + $0x48] sm:$0xff]  ;;  %v659_v21 = vld [vmem:[%s2151_s21 + $0x58] sm:$0xff]  ;;  %s894_s12 = sshll.u32 %s510_s15, 4  ;;  %s2219_s8 = scalar_lea.vmem [#allocation19], %s2158_s3  ;;  %s2235_s12 = int_to_ptr.vmem [resolvable:$true] %s894_s12 }
  0xdd   : > { %v1258_v19 = vpack.c.bf16 %v537_v16, %v535_v15  ;;  %v656_v22 = vld [vmem:[%s2151_s21 + $0x40] sm:$0xff]  ;;  %1269 = vmatprep.subr.bf16.mxu0 %v1268_v10  ;;  %v1272_v23 = vpack.c.bf16 %v659_v21, %v657_v20  ;;  %v658_v24 = vld [vmem:[%s2151_s21 + $0x50] sm:$0xff]  ;;  %v540_v25 = vld [vmem:[%s2140_s1 + $0x28] sm:$0xff]  ;;  %s524_s26 = scalar_lea.vmem [#allocation17], %s2158_s3  ;;  %s2229_s29 = scalar_lea.hbm %s2447_s7, %s2215_s25 }
  0xde   : > { %v542_v26 = vld [vmem:[%s2140_s1 + $0x38] sm:$0xff]  ;;  %1257 = vmatprep.subr.bf16.mxu1 %v1256_v18  ;;  %v539_v28 = vld [vmem:[%s2140_s1 + $0x20] sm:$0xff]  ;;  %v541_v29 = vld [vmem:[%s2140_s1 + $0x30] sm:$0xff]  ;;  %v1274_v33 = vpack.c.bf16 %v658_v24, %v656_v22  ;;  %s922_s10 = sshll.u32 %s524_s26, 4  ;;  %s2517_s13 = sld [smem:[#allocation31_spill]]  ;;  %s2246_s10 = int_to_ptr.vmem [resolvable:$true] %s922_s10 }
  0xdf   : > { %v1260_v27 = vpack.c.bf16 %v542_v26, %v540_v25  ;;  %v661_v30 = vld [vmem:[%s2151_s21 + $0x68] sm:$0xff]  ;;  %1259 = vmatpush1.bf16.msra.mxu1 %v1258_v19  ;;  %v1262_v31 = vpack.c.bf16 %v541_v29, %v539_v28  ;;  %v663_v32 = vld [vmem:[%s2151_s21 + $0x78] sm:$0xff]  ;;  %v660_v35 = vld [vmem:[%s2151_s21 + $0x60] sm:$0xff]  ;;  %s2518_s6 = sld [smem:[#allocation37_spill]]  ;;  %s851_s17 = scalar_lea.sflag [#allocation15], %s2147_s27 }
  0xe0   : > { %1271 = vmatpush1.bf16.msra.mxu0 %v1270_v17  ;;  %v1276_v34 = vpack.c.bf16 %v663_v32, %v661_v30  ;;  %v662_v36 = vld [vmem:[%s2151_s21 + $0x70] sm:$0xff]  ;;  %v544_v37 = vld [vmem:[%s2140_s1 + $0x48] sm:$0xf]  ;;  %v543_v40 = vld [vmem:[%s2140_s1 + $0x40] sm:$0xf]  ;;  %s1599_s18 = scalar_lea.vmem %s2235_s12, 256 }
  0xe1   : > { %1261 = vmatprep.subr.bf16.mxu1 %v1260_v27  ;;  %1273 = vmatprep.subr.bf16.mxu0 %v1272_v23  ;;  %v760_v38 = vld [vmem:[#allocation11 + $0x8] sm:$0xff]  ;;  %v1278_v39 = vpack.c.bf16 %v662_v36, %v660_v35  ;;  %v762_v41 = vld [vmem:[#allocation11 + $0x18] sm:$0xff]  ;;  %v532_v42 = vld [vmem:[#allocation8] sm:$0xff]  ;;  %p1600_p7 = scmp.ne.s32.totalorder %s2235_s12, %s1599_s18 }
  0xe2   : > { %776 = vperm.xlu0 %1403, %v760_v38   ;;  %v665_v43 = vld [vmem:[%s2151_s21 + $0x88] sm:$0xff]  ;;  %790 = vperm.xlu1 %1404, %v762_v41   ;;  %v759_v44 = vld [vmem:[#allocation11] sm:$0xff]  ;;  %v761_v45 = vld [vmem:[#allocation11 + $0x10] sm:$0xff] }
  0xe3   : > { %1263 = vmatpush1.bf16.msra.mxu1 %v1262_v31  ;;  %v664_v46 = vld [vmem:[%s2151_s21 + $0x80] sm:$0xff]  ;;  %v533_v47 = vld [vmem:[#allocation8 + $0x8] sm:$0xff]  ;;  %v645_v48 = vld [vmem:[#allocation10] sm:$0xff]  ;;  %s2519_s21 = sld [smem:[#allocation36_spill]] }
  0xe4   : > { %1275 = vmatpush1.bf16.msra.mxu0 %v1274_v33  ;;  %1221 = vmatprep.subr.msk.mxu1 %vm555_vm0, %v544_v37  ;;  %v534_v49 = vld [vmem:[#allocation8 + $0x10] sm:$0xff]  ;;  %v646_v50 = vld [vmem:[#allocation10 + $0x8] sm:$0xff]  ;;  %v647_v51 = vld [vmem:[#allocation10 + $0x10] sm:$0xff]  ;;  %p2520_p12 = scmp.ne.s32.totalorder %s2517_s13, 0 }
  0xe5   : > { %1277 = vmatprep.subr.bf16.mxu0 %v1276_v34  ;;  %s2244_s1 = scalar_lea.hbm %s2518_s6, %s2215_s25 }
  0xe6   : > { %767 = vperm.xlu0 %1403, %v759_v44   ;;  %783 = vperm.xlu1 %1404, %v761_v45   ;;  %p1601_p2 = pnand %p1600_p7, %p2520_p12 }
  0xe7   : > { %1222 = vmatpush1.msk.msra.mxu1 %vm555_vm0, %v543_v40 }
  0xe8   : > { %1279 = vmatpush1.bf16.msra.mxu0 %v1278_v39  ;;  %1223 = vmatmul.mubr.msk.f32.vlgmr.msra.gmra.mrb[0].mxu1 %vm545_vm1, %v532_v42  ;;  %p1602_p11 = pneg %p1601_p2 }
  0xe9   : > { %692 = vmatprep.subr.mxu0 %v665_v43  ;;  %632 = vmatprep.mubr.f32.mxu1 %v1809_v0  ;;  %s2254_s11 = scalar_lea.hbm %s2519_s21, %s2215_s25 }
  0xec   : > { %693 = vmatpush1.msra.mxu0 %v664_v46  ;;  %1224 = vmatmul.mubr.msk.f32.gmra.mrb[2].mxu1 %vm545_vm1, %v533_v47 }
  0xed   : > { %1226 = vmatmul.mubr.msk.f32.vlgmr.msra.gmra.mrb[0].mxu0 %vm666_vm2, %v645_v48  ;;  %638 = vmatprep.mubr.f32.mxu1 %v1809_v0 }
  0xee   : > { %746 = vmatprep.mubr.f32.mxu0 %v1809_v0 }
  0xf0   : > { %1225 = vmatmul.mubr.msk.f32.gmra.mrb[4].mxu1 %vm545_vm1, %v534_v49 }
  0xf1   : > { %1227 = vmatmul.mubr.msk.f32.gmra.mrb[2].mxu0 %vm666_vm2, %v646_v50 }
  0xf2   : > { %752 = vmatprep.mubr.f32.mxu0 %v1809_v0 }
  0xf5   : > { %1228 = vmatmul.mubr.msk.f32.gmra.mrb[4].mxu0 %vm666_vm2, %v647_v51 }
 0x161   : > { %v2206_v52 = vpop.permute.xlu0 %776  ;;  %v2208_v54 = vpop.permute.xlu1 %790 }
 0x165   : > { %v768_v56 = vpop.permute.xlu0 %767  ;;  %v784_v62 = vpop.permute.xlu1 %783 }
 0x1bb   : > { %v628_v53 = vpop.f32.mrb[0].mxu1 }
 0x1bc   : > { %v630_v55 = vpop.f32.mrb[1].mxu1 }
 0x1bf   : > { %v634_v57 = vpop.f32.mrb[2].mxu1 }
 0x1c0   : > { %v742_v58 = vpop.f32.mrb[0].mxu0  ;;  %v636_v59 = vpop.f32.mrb[3].mxu1 }
 0x1c1   : > { %v763_v60 = vadd.f32 %v742_v58, %v628_v53  ;;  %v744_v61 = vpop.f32.mrb[1].mxu0 }
 0x1c2   : > { %v764_v63 = vadd.f32 %v744_v61, %v630_v55 }
 0x1c3   : > { %v2223_v0 = vadd.f32 %v768_v56, %v763_v60  ;;  %v640_v1 = vpop.f32.mrb[4].mxu1 }
 0x1c4   : > { %v2231_v2 = vadd.f32 %v768_v56, %v764_v63  ;;  %v748_v3 = vpop.f32.mrb[2].mxu0  ;;  %v2233_v4 = vadd.f32 %v784_v62, %v640_v1  ;;  %v642_v5 = vpop.f32.mrb[5].mxu1 }
 0x1c5   : > { %837 = vst [vmem:[%s510_s15] sm:$0xff] %v2223_v0  ;;  %v772_v6 = vadd.f32 %v748_v3, %v634_v57  ;;  %v750_v7 = vpop.f32.mrb[3].mxu0  ;;  %v2238_v8 = vadd.f32 %v784_v62, %v642_v5 }
 0x1c6   : > { %838 = vst [vmem:[%s510_s15 + $0x8] sm:$0xff] %v2231_v2  ;;  %v773_v9 = vadd.f32 %v750_v7, %v636_v59  ;;  %841 = vst [vmem:[%s524_s26] sm:$0xff] %v2233_v4  ;;  %s1811_s15 = smov [#allocation14]  }
 0x1c7   : > { %v779_v10 = vadd.f32 %v2206_v52, %v772_v6  ;;  %842 = vst [vmem:[%s524_s26 + $0x8] sm:$0xff] %v2238_v8  ;;  %s1603_s30 = sshll.u32 %s1811_s15, 4  ;;  %s1604_s30 = int_to_ptr.vmem [resolvable:$false] %s1603_s30 }
 0x1c8   : > { %s1605_s22 = scalar_lea.vmem %s1604_s30, 512  ;;  %p1606_p9 = scmp.lt.s32.totalorder %s2235_s12, %s1604_s30 }
 0x1c9   : > { %p1607_p10 = scmp.lt.s32.totalorder %s1605_s22, %s1599_s18 }
 0x1cb   : > { %p1608_p4 = por %p1607_p10, %p1606_p9 }
 0x1cd   : > { %p1609_p6 = pnand %p1608_p4, %p1602_p11 }
 0x1cf   : > { %1612 = shalt.err (!%p1609_p6)
}
 0x1d0   : > { %s1613_s26 = scalar_lea.hbm %s2229_s29, 256  ;;  %s1617_s15 = scalar_lea.hbm %s2447_s7, 512 }
 0x1d1   : > { %p1614_p1 = scmp.ne.s32.totalorder %s2229_s29, %s1613_s26  ;;  %p1618_p5 = scmp.lt.u32.totalorder %s2229_s29, %s2447_s7 }
 0x1d2   : > { %p1619_p13 = scmp.lt.u32.totalorder %s1617_s15, %s1613_s26  ;;  %p1621_p7 = scmp.lt.u32.totalorder %s1613_s26, %s2229_s29 }
 0x1d3   : > { %p1615_p8 = pnand %p1614_p1, %p2520_p12 }
 0x1d4   : > { %p1620_p3 = por %p1619_p13, %p1618_p5 }
 0x1d5   : > { %p1616_p0 = pneg %p1615_p8 }
 0x1d6   : > { %p1622_p2 = por %p1621_p7, %p1620_p3 }
 0x1d8   : > { %p1623_p11 = pnand %p1622_p2, %p1616_p0 }
 0x1da   : > { %1626 = shalt.err (!%p1623_p11)
}
 0x1db   : > { %1309 = dma.vmem_to_hbm [thread:$0]  (%p2520_p12), %s2235_s12, 256, %s2229_s29, %s851_s17   ;;  %v780_v11 = vadd.f32 %v2206_v52, %v773_v9  ;;  %v754_v12 = vpop.f32.mrb[4].mxu0 }
 0x1dc   : > { %s861_s22 = scalar_lea.sflag [#allocation18], %s2147_s27  ;;  %s1627_s28 = scalar_lea.vmem %s2246_s10, 256 }
 0x1dd   : > { %p1628_p9 = scmp.ne.s32.totalorder %s2246_s10, %s1627_s28  ;;  %s1812_s18 = smov [#allocation17]  }
 0x1de   : > { %s1631_s26 = sshll.u32 %s1812_s18, 4  ;;  %s1632_s26 = int_to_ptr.vmem [resolvable:$false] %s1631_s26 }
 0x1df   : > { %p1629_p10 = pnand %p1628_p9, %p2520_p12  ;;  %s1633_s20 = scalar_lea.vmem %s1632_s26, 512 }
 0x1e0   : > { %p1634_p6 = scmp.lt.s32.totalorder %s2246_s10, %s1632_s26  ;;  %p1635_p1 = scmp.lt.s32.totalorder %s1633_s20, %s1627_s28 }
 0x1e1   : > { %p1630_p4 = pneg %p1629_p10 }
 0x1e2   : > { %p1636_p8 = por %p1635_p1, %p1634_p6 }
 0x1e4   : > { %p1637_p0 = pnand %p1636_p8, %p1630_p4 }
 0x1e6   : > { %1640 = shalt.err (!%p1637_p0)
}
 0x1e7   : > { %s1641_s12 = scalar_lea.hbm %s2244_s1, 256  ;;  %s1645_s15 = scalar_lea.hbm %s2518_s6, 512 }
 0x1e8   : > { %p1642_p5 = scmp.ne.s32.totalorder %s2244_s1, %s1641_s12  ;;  %p1646_p7 = scmp.lt.u32.totalorder %s2244_s1, %s2518_s6 }
 0x1e9   : > { %p1647_p2 = scmp.lt.u32.totalorder %s1645_s15, %s1641_s12  ;;  %p1649_p9 = scmp.lt.u32.totalorder %s1641_s12, %s2244_s1 }
 0x1ea   : > { %p1643_p13 = pnand %p1642_p5, %p2520_p12 }
 0x1eb   : > { %p1648_p11 = por %p1647_p2, %p1646_p7 }
 0x1ec   : > { %p1644_p3 = pneg %p1643_p13 }
 0x1ed   : > { %p1650_p10 = por %p1649_p9, %p1648_p11 }
 0x1ef   : > { %p1651_p4 = pnand %p1650_p10, %p1644_p3 }
 0x1f1   : > { %1654 = shalt.err (!%p1651_p4)
}
 0x1f2   : > { %1311 = dma.vmem_to_hbm [thread:$0]  (%p2520_p12), %s2246_s10, 256, %s2244_s1, %s861_s22   ;;  %v1231_v13 = vmul.f32 -1.442695, %v779_v10  ;;  %839 = vst [vmem:[%s2211_s24] sm:$0xff] %v779_v10  ;;  %v2313_v14 = vadd.f32 %v2208_v54, %v754_v12  ;;  %v756_v15 = vpop.f32.mrb[5].mxu0  ;;  %v1232_v16 = vmul.f32 -1.442695, %v780_v11 }
 0x1f3   : > { %840 = vst [vmem:[%s2211_s24 + $0x8] sm:$0xff] %v780_v11  ;;  %s2521_s28 = sshll.u32 %s2219_s8, 4  ;;  %v2321_v17 = vadd.f32 %v2208_v54, %v756_v15  ;;  %s2522_s12 = sld [smem:[#allocation38_spill]]  ;;  %s2318_s28 = int_to_ptr.vmem [resolvable:$true] %s2521_s28 }
 0x1f4   : > { %1405 = vpow2.f32 %v1231_v13  ;;  %843 = vst [vmem:[%s2219_s8] sm:$0xff] %v2313_v14  ;;  %s1655_s10 = scalar_lea.vmem %s2258_s9, 256  ;;  %s1813_s24 = smov [#allocation16]  }
 0x1f5   : > { %p1656_p6 = scmp.ne.s32.totalorder %s2258_s9, %s1655_s10  ;;  %s1659_s1 = sshll.u32 %s1813_s24, 4  ;;  %s1660_s1 = int_to_ptr.vmem [resolvable:$false] %s1659_s1 }
 0x1f6   : > { %s1661_s23 = scalar_lea.vmem %s1660_s1, 512  ;;  %p1662_p0 = scmp.lt.s32.totalorder %s2258_s9, %s1660_s1 }
 0x1f7   : > { %p1657_p1 = pnand %p1656_p6, %p2520_p12  ;;  %p1663_p5 = scmp.lt.s32.totalorder %s1661_s23, %s1655_s10 }
 0x1f9   : > { %s2327_s29 = scalar_lea.hbm %s2522_s12, %s2215_s25  ;;  %p1658_p8 = pneg %p1657_p1 }
 0x1fa   : > { %p1664_p13 = por %p1663_p5, %p1662_p0 }
 0x1fc   : > { %p1665_p3 = pnand %p1664_p13, %p1658_p8 }
 0x1fe   : > { %1668 = shalt.err (!%p1665_p3)
}
 0x1ff   : > { %s1669_s15 = scalar_lea.hbm %s2254_s11, 256  ;;  %s1673_s26 = scalar_lea.hbm %s2519_s21, 512 }
 0x200   : > { %p1670_p7 = scmp.ne.s32.totalorder %s2254_s11, %s1669_s15  ;;  %p1674_p9 = scmp.lt.u32.totalorder %s2254_s11, %s2519_s21 }
 0x201   : > { %p1675_p10 = scmp.lt.u32.totalorder %s1673_s26, %s1669_s15  ;;  %p1677_p6 = scmp.lt.u32.totalorder %s1669_s15, %s2254_s11 }
 0x202   : > { %p1671_p2 = pnand %p1670_p7, %p2520_p12 }
 0x203   : > { %p1676_p4 = por %p1675_p10, %p1674_p9 }
 0x204   : > { %p1672_p11 = pneg %p1671_p2 }
 0x205   : > { %p1678_p1 = por %p1677_p6, %p1676_p4 }
 0x207   : > { %p1679_p8 = pnand %p1678_p1, %p1672_p11 }
 0x209   : > { %1682 = shalt.err (!%p1679_p8)
}
 0x20a   : > { %1310 = dma.vmem_to_hbm [thread:$0]  (%p2520_p12), %s2258_s9, 256, %s2254_s11, %s851_s17   ;;  %v1229_v18 = vmul.f32 -1.442695, %v2223_v0  ;;  %1407 = vpow2.f32 %v1232_v16  ;;  %844 = vst [vmem:[%s2219_s8 + $0x8] sm:$0xff] %v2321_v17  ;;  %v1230_v19 = vmul.f32 -1.442695, %v2231_v2 }
 0x20b   : > { %s1683_s10 = scalar_lea.vmem %s2318_s28, 256  ;;  %s1814_s1 = smov [#allocation19]  }
 0x20c   : > { %p1684_p0 = scmp.ne.s32.totalorder %s2318_s28, %s1683_s10  ;;  %s1687_s23 = sshll.u32 %s1814_s1, 4  ;;  %s1688_s23 = int_to_ptr.vmem [resolvable:$false] %s1687_s23 }
 0x20d   : > { %s1689_s15 = scalar_lea.vmem %s1688_s23, 512  ;;  %p1690_p3 = scmp.lt.s32.totalorder %s2318_s28, %s1688_s23 }
 0x20e   : > { %p1685_p5 = pnand %p1684_p0, %p2520_p12  ;;  %p1691_p7 = scmp.lt.s32.totalorder %s1689_s15, %s1683_s10 }
 0x210   : > { %p1686_p13 = pneg %p1685_p5  ;;  %p1692_p2 = por %p1691_p7, %p1690_p3 }
 0x212   : > { %p1693_p11 = pnand %p1692_p2, %p1686_p13 }
 0x214   : > { %1696 = shalt.err (!%p1693_p11)
}
 0x215   : > { %s1697_s9 = scalar_lea.hbm %s2327_s29, 256  ;;  %s1701_s17 = scalar_lea.hbm %s2522_s12, 512 }
 0x216   : > { %p1698_p9 = scmp.ne.s32.totalorder %s2327_s29, %s1697_s9  ;;  %p1702_p6 = scmp.lt.u32.totalorder %s2327_s29, %s2522_s12 }
 0x217   : > { %p1703_p1 = scmp.lt.u32.totalorder %s1701_s17, %s1697_s9  ;;  %p1705_p0 = scmp.lt.u32.totalorder %s1697_s9, %s2327_s29 }
 0x218   : > { %p1699_p10 = pnand %p1698_p9, %p2520_p12 }
 0x219   : > { %p1704_p8 = por %p1703_p1, %p1702_p6 }
 0x21a   : > { %p1700_p4 = pneg %p1699_p10 }
 0x21b   : > { %p1706_p5 = por %p1705_p0, %p1704_p8 }
 0x21d   : > { %p1707_p13 = pnand %p1706_p5, %p1700_p4 }
 0x21f   : > { %1710 = shalt.err (!%p1707_p13)
}
 0x220   : > { %1312 = dma.vmem_to_hbm [thread:$0]  (%p2520_p12), %s2318_s28, 256, %s2327_s29, %s861_s22   ;;  %1409 = vpow2.f32 %v1229_v18  ;;  %v1406_v20 = vpop.eup %1405 }
 0x221   : > { %1411 = vpow2.f32 %v1230_v19  ;;  %v1408_v21 = vpop.eup %1407  ;;  %v813_v22 = vadd.f32 1.0, %v1406_v20  ;;  %s2523_s27 = scalar_lea.vmem [#allocation7], %s2158_s3  ;;  %s503_s28 = scalar_lea.vmem [#allocation13], %s2158_s3 }
 0x222   : > { %v814_v23 = vadd.f32 1.0, %v1408_v21  ;;  %v825_v37 = vld [vmem:[%s2523_s27] sm:$0xff]  ;;  %s2524_s22 = smov %s2523_s27  ;;  %s880_s29 = sshll.u32 %s503_s28, 4  ;;  %s2396_s29 = int_to_ptr.vmem [resolvable:$true] %s880_s29 }
 0x223   : > { %1413 = vrcp.f32 %v813_v22  ;;  %v826_v39 = vld [vmem:[%s2524_s22 + $0x8] sm:$0xff]  ;;  %s2525_s24 = sld [smem:[#allocation35_spill]]  ;;  %s846_s1 = scalar_lea.sflag [#allocation4], %s2136_s19 }
 0x224   : > { %1415 = vrcp.f32 %v814_v23  ;;  %s1711_s23 = scalar_lea.vmem %s2396_s29, 256  ;;  %s1815_s3 = smov [#allocation13]  }
 0x225   : > { %p1712_p3 = scmp.ne.s32.totalorder %s2396_s29, %s1711_s23  ;;  %s1715_s15 = sshll.u32 %s1815_s3, 4  ;;  %s1716_s15 = int_to_ptr.vmem [resolvable:$false] %s1715_s15 }
 0x226   : > { %s1717_s9 = scalar_lea.vmem %s1716_s15, 512  ;;  %p1718_p11 = scmp.lt.s32.totalorder %s2396_s29, %s1716_s15 }
 0x227   : > { %p1713_p7 = pnand %p1712_p3, %p2520_p12  ;;  %p1719_p9 = scmp.lt.s32.totalorder %s1717_s9, %s1711_s23 }
 0x229   : > { %s2394_s10 = scalar_lea.hbm %s2525_s24, %s2215_s25  ;;  %p1714_p2 = pneg %p1713_p7 }
 0x22a   : > { %v1410_v24 = vpop.eup %1409  ;;  %p1720_p10 = por %p1719_p9, %p1718_p11 }
 0x22b   : > { %v1412_v25 = vpop.eup %1411  ;;  %v801_v26 = vadd.f32 1.0, %v1410_v24 }
 0x22c   : > { %v802_v27 = vadd.f32 1.0, %v1412_v25  ;;  %p1721_p4 = pnand %p1720_p10, %p1714_p2 }
 0x22d   : > { %1417 = vrcp.f32 %v801_v26  ;;  %v1414_v28 = vpop.eup %1413 }
 0x22e   : > { %1419 = vrcp.f32 %v802_v27  ;;  %v1416_v29 = vpop.eup %1415  ;;  %v819_v30 = vmul.f32 %v1414_v28, %v2313_v14 }
 0x22f   : > { %v820_v31 = vmul.f32 %v1416_v29, %v2321_v17 }
 0x230   : > { %v821_v32 = vadd.f32 %v819_v30, %v2233_v4 }
 0x231   : > { %v822_v33 = vadd.f32 %v820_v31, %v2238_v8 }
 0x232   : > { %1421 = vtanh.f32 %v821_v32 }
 0x233   : > { %1423 = vtanh.f32 %v822_v33 }
 0x237   : > { %v1418_v34 = vpop.eup %1417 }
 0x238   : > { %v1420_v35 = vpop.eup %1419  ;;  %v827_v36 = vsub.f32 1.0, %v1418_v34 }
 0x239   : > { %v828_v38 = vsub.f32 1.0, %v1420_v35 }
 0x23a   : > { %v829_v43 = vmul.f32 %v827_v36, %v825_v37 }
 0x23b   : > { %v830_v44 = vmul.f32 %v828_v38, %v826_v39 }
 0x23c   : > { %v1422_v40 = vpop.eup %1421 }
 0x23d   : > { %v1424_v41 = vpop.eup %1423  ;;  %v831_v42 = vmul.f32 %v1422_v40, %v1418_v34 }
 0x23e   : > { %v832_v45 = vmul.f32 %v1424_v41, %v1420_v35 }
 0x23f   : > { %v833_v46 = vadd.f32 %v831_v42, %v829_v43 }
 0x240   : > { %v834_v47 = vadd.f32 %v832_v45, %v830_v44 }
 0x241   : > { %835 = vst [vmem:[%s503_s28] sm:$0xff] %v833_v46 }
 0x242   : > { %836 = vst [vmem:[%s503_s28 + $0x8] sm:$0xff] %v834_v47 }
 0x243   : > { %1724 = shalt.err (!%p1721_p4)
}
 0x244   : > { %s1725_s19 = scalar_lea.hbm %s2394_s10, 256  ;;  %s1729_s11 = scalar_lea.hbm %s2525_s24, 512 }
 0x245   : > { %p1726_p6 = scmp.ne.s32.totalorder %s2394_s10, %s1725_s19  ;;  %p1730_p0 = scmp.lt.u32.totalorder %s2394_s10, %s2525_s24 }
 0x246   : > { %p1731_p5 = scmp.lt.u32.totalorder %s1729_s11, %s1725_s19  ;;  %p1733_p3 = scmp.lt.u32.totalorder %s1725_s19, %s2394_s10 }
 0x247   : > { %p1727_p1 = pnand %p1726_p6, %p2520_p12 }
 0x248   : > { %p1732_p13 = por %p1731_p5, %p1730_p0 }
 0x249   : > { %p1728_p8 = pneg %p1727_p1 }
 0x24a   : > { %p1734_p7 = por %p1733_p3, %p1732_p13 }
 0x24c   : > { %p1735_p2 = pnand %p1734_p7, %p1728_p8 }
 0x24e   : > { %1738 = shalt.err (!%p1735_p2)
}
 0x24f   : > { %1308 = dma.vmem_to_hbm [thread:$0]  (%p2520_p12), %s2396_s29, 256, %s2394_s10, %s846_s1  }
 0x250 PF: > { %s2526_s18 = sld [smem:[#allocation27_spill]]  ;;  %s2527_s27 = sld [smem:[#allocation32_spill]] }
 0x251   : > { %p2529_p9 = scmp.ge.s32.totalorder %s1797_s16, 2 }
 0x256   : > { %s948_s22 = sand.u32 1, %s2526_s18   ;;  %p2528_p11 = scmp.ne.s32.totalorder %s2527_s27, 0 }
 0x257   : > { %s949_s28 = scalar_lea.sflag [#allocation4], %s948_s22 }
 0x258   : > { %p1339_p10 = pnand %p2529_p9, %p2528_p11 }
 0x25a   : > { %1772 = dma.done.wait (!%p1339_p10), %s949_s28, 256  }
 0x25b   : > { %1774 = vsyncadd (!%p1339_p10), %s949_s28, 4294967040  ;;  %s2530_s26 = sadd.s32 4294967294, %s1797_s16  }
 0x25c   : > { %s957_s20 = sand.u32 1, %s2530_s26  }
 0x25d   : > { %s958_s23 = scalar_lea.sflag [#allocation15], %s957_s20 }
 0x25e   : > { %1776 = dma.done.wait (!%p1339_p10), %s958_s23, 512  }
 0x25f   : > { %1778 = vsyncadd (!%p1339_p10), %s958_s23, 4294966784  ;;  %s976_s13 = scalar_lea.sflag [#allocation18], %s957_s20 }
 0x260   : > { %1780 = dma.done.wait (!%p1339_p10), %s976_s13, 512  }
 0x261   : > { %1782 = vsyncadd (!%p1339_p10), %s976_s13, 4294966784  ;;  %s2531_s16 = sld [smem:[#allocation29_spill]]  ;;  %s2532_s29 = sld [smem:[#allocation28_spill]] }
 0x262   : > { %s2533_s15 = sld [smem:[#allocation30_spill]]  ;;  %s2534_s13 = smov %s1789_s14 }
 0x267   : > { %p35_p12 = scmp.ge.s32.totalorder %s2531_s16, 4   ;;  %s2535_s14 = smov %s2532_s29 }
 0x269   :  { %37 = sbr.rel (!%p35_p12) target bundleno = 20 (0x14), region = 189 }
 0x270   :  { %990 = vsyncpa [#allocation3], 1 }
 0x271   :  { %992 = vsyncpa [#allocation3 + $0x1], 1 }
 0x272   :  { %993 = vsyncpa [#allocation6], 1 }
 0x273   :  { %995 = vsyncpa [#allocation6 + $0x1], 1 }
 0x274   :  { %996 = vsyncpa [#allocation9], 1 }
 0x275   :  { %997 = vsyncpa [#allocation12], 1 }
 0x276   :  { %998 = vsyncpa [#allocation4], 1 }
 0x277   :  { %1000 = vsyncpa [#allocation4 + $0x1], 1 }
 0x278   :  { %1001 = vsyncpa [#allocation15], 1 }
 0x279   :  { %1003 = vsyncpa [#allocation15 + $0x1], 1 }
 0x27a   :  { %1004 = vsyncpa [#allocation18], 1 }
 0x27b   :  { %1006 = vsyncpa [#allocation18 + $0x1], 1 }

</bundles_post_ra>
